<compile_context>
chip_gen: v5e
topology: v5e:2x2
jax: 0.10.0
libtpu: 0.0.40
codegen_flags: <defaults>
</compile_context>

<pallas_src>
import math

import jax
import jax.numpy as jnp
import numpy as np
from jax import lax
from jax.experimental import pallas as pl
from jax.experimental.pallas import tpu as pltpu

# ----------------------------- problem sizes --------------------------------
B = 2          # batch
NQ = 8         # query sequence length
NK = 12        # key/value sequence length
DIM_Q = 16
DIM_K = 24
DIM_V = 48
NUM_HEADS = 6
DS = DIM_V // NUM_HEADS     # dim_split = 8

BNQ = B * NQ                # 16 flattened query rows
BNK = B * NK                # 24 flattened key rows
HKV = NUM_HEADS * BNK       # 144 head-expanded key columns

# ------------------------- packed-parameter slab layout ----------------------
ROW_BBIAS = 0                       # (BNQ, HKV)        additive same-batch bias
ROW_WQ    = 16                      # (DIM_Q, DIM_V)    Wq
ROW_WKV   = 32                      # (DIM_K, 2*DIM_V)  [Wk | Wv]
ROW_WO    = 56                      # (DIM_V, DIM_V)    Wo
ROW_BIAS  = 104                     # rows 104..107 = bq, bk, bv, bo
ROW_HMASK = 112                     # (HKV, DIM_V)      head block-diagonal mask
SLAB_ROWS = ROW_HMASK + HKV         # 256 (all offsets are multiples of 8)
SLAB_COLS = HKV                     # 144


# ------------------------------ Pallas kernel -------------------------------
def mab_kernel(q_ref, v_ref, p_ref, o_ref):
    # Single invocation, whole problem resident in VMEM.
    #   q_ref : (BNQ, DIM_Q)             flattened queries
    #   v_ref : (BNK, DIM_K)             flattened key/value inputs
    #   p_ref : (SLAB_ROWS, SLAB_COLS)   packed params + constants (layout above)
    #   o_ref : (BNQ, DIM_V)
    q_in = q_ref[...]
    v_in = v_ref[...]

    wq    = p_ref[ROW_WQ:ROW_WQ + DIM_Q, 0:DIM_V]             # (16, 48)
    wkv   = p_ref[ROW_WKV:ROW_WKV + DIM_K, 0:2 * DIM_V]       # (24, 96)
    wo    = p_ref[ROW_WO:ROW_WO + DIM_V, 0:DIM_V]             # (48, 48)
    b_all = p_ref[ROW_BIAS:ROW_BIAS + 8, 0:DIM_V]             # rows: bq,bk,bv,bo,0..
    hmask = p_ref[ROW_HMASK:ROW_HMASK + HKV, 0:DIM_V]         # (144, 48)
    bbias = p_ref[ROW_BBIAS:ROW_BBIAS + BNQ, 0:HKV]           # (16, 144)

    # Projections (2 MXU pushes): Q, and fused [K | V] on batch-flattened inputs.
    q = jnp.dot(q_in, wq, preferred_element_type=jnp.float32) + b_all[0:1, :]
    kv = jnp.dot(v_in, wkv, preferred_element_type=jnp.float32)
    k = kv[:, :DIM_V] + b_all[1:2, :]
    v = kv[:, DIM_V:] + b_all[2:3, :]

    # Head-block-diagonal expansion: rows h*BNK..(h+1)*BNK of Kexp/Vexp carry
    # only head h's 8 feature columns, so ONE matmul produces all heads' logits
    # and ONE matmul produces the already-concatenated per-head PV outputs.
    kexp = jnp.concatenate([k] * NUM_HEADS, axis=0) * hmask    # (144, 48)
    vexp = jnp.concatenate([v] * NUM_HEADS, axis=0) * hmask    # (144, 48)

    # torch divides by sqrt(Q.shape[-1]) of the *projected* Q, i.e. sqrt(dim_V).
    scale = 1.0 / math.sqrt(DIM_V)
    logits = lax.dot_general(q, kexp, (((1,), (1,)), ((), ())),
                             preferred_element_type=jnp.float32) * scale + bbias

    # Softmax over each head's 24 key columns.  A row-wide max is a valid
    # stabilizer for every segment; masked entries (-1e30 bias) exp to exactly
    # 0; the per-head sums come from the block-mask matmul below.
    m = jnp.max(logits, axis=-1, keepdims=True)                 # (16, 1)
    p = jnp.exp(logits - m)                                     # (16, 144)

    pv    = jnp.dot(p, vexp, preferred_element_type=jnp.float32)    # (16, 48)
    denom = jnp.dot(p, hmask, preferred_element_type=jnp.float32)   # (16, 48)
    attn  = pv * pl.reciprocal(denom, approx=False)    # exact (1e-5 tolerance)

    # Residual, output projection, ReLU residual — all at full (16, 48) width.
    o = q + attn
    o_proj = jnp.dot(o, wo, preferred_element_type=jnp.float32) + b_all[3:4, :]
    o_ref[...] = o + jnp.maximum(o_proj, 0.0)
    # TODO(synk): the optional boolean `mask` argument (masked_fill -100.0) of
    # MAB.forward is not implemented; this kernel covers the mask=None path only.


# ------------------------------- wrapper -------------------------------------
def pack_params(params):
    """One-time host-side packing of all weights, biases and structural
    constants into a single slab (one DMA descriptor at kernel launch)."""
    wq, bq, wk, bk, wv, bv, wo, bo = (np.asarray(t, np.float32) for t in params)

    slab = np.zeros((SLAB_ROWS, SLAB_COLS), np.float32)

    # Same-batch additive mask bias: 0 where query row and key column belong to
    # the same batch element, -1e30 elsewhere (exp -> exactly 0).
    q_batch = np.arange(BNQ)[:, None] // NQ
    k_batch = (np.arange(HKV)[None, :] % BNK) // NK
    slab[ROW_BBIAS:ROW_BBIAS + BNQ, 0:HKV] = np.where(q_batch == k_batch, 0.0, -1e30)

    slab[ROW_WQ:ROW_WQ + DIM_Q, 0:DIM_V] = wq
    slab[ROW_WKV:ROW_WKV + DIM_K, 0:DIM_V] = wk
    slab[ROW_WKV:ROW_WKV + DIM_K, DIM_V:2 * DIM_V] = wv
    slab[ROW_WO:ROW_WO + DIM_V, 0:DIM_V] = wo
    slab[ROW_BIAS + 0, 0:DIM_V] = bq
    slab[ROW_BIAS + 1, 0:DIM_V] = bk
    slab[ROW_BIAS + 2, 0:DIM_V] = bv
    slab[ROW_BIAS + 3, 0:DIM_V] = bo

    # Head block-diagonal mask: rows h*BNK..(h+1)*BNK are 1 only in head h's
    # 8 feature columns.  Reused as the Kexp/Vexp mask and as the per-head
    # softmax-sum + broadcast matrix.
    head_of_row = np.arange(HKV)[:, None] // BNK
    head_of_col = np.arange(DIM_V)[None, :] // DS
    slab[ROW_HMASK:ROW_HMASK + HKV, 0:DIM_V] = (head_of_row == head_of_col)

    return jnp.asarray(slab)


@jax.jit
def mab_forward(Q, Vin, slab):
    qf = Q.reshape(BNQ, DIM_Q)
    vf = Vin.reshape(BNK, DIM_K)

    vmem = pl.BlockSpec(memory_space=pltpu.MemorySpace.VMEM)
    out = pl.pallas_call(
        mab_kernel,
        out_shape=jax.ShapeDtypeStruct((BNQ, DIM_V), jnp.float32),
        in_specs=[vmem, vmem, vmem],
        out_specs=vmem,
    )(qf, vf, slab)
    return out.reshape(B, NQ, DIM_V)


# --------------------------- pure-JAX reference ------------------------------
def mab_reference(Q, Vin, params):
    wq, bq, wk, bk, wv, bv, wo, bo = params
    q = Q @ wq + bq
    k = Vin @ wk + bk
    v = Vin @ wv + bv
    qh = jnp.stack(jnp.split(q, NUM_HEADS, axis=-1), axis=0)
    kh = jnp.stack(jnp.split(k, NUM_HEADS, axis=-1), axis=0)
    vh = jnp.stack(jnp.split(v, NUM_HEADS, axis=-1), axis=0)
    logits = jnp.einsum('hbqd,hbkd->hbqk', qh, kh) / math.sqrt(DIM_V)
    a = jax.nn.softmax(logits, axis=-1)
    oh = qh + jnp.einsum('hbqk,hbkd->hbqd', a, vh)
    o = jnp.concatenate([oh[h] for h in range(NUM_HEADS)], axis=-1)  # (B, NQ, DIM_V)
    return o + jax.nn.relu(o @ wo + bo)


# ---------------------------------- main --------------------------------------
def _init_params(key):
    ks = jax.random.split(key, 8)

    def linear(kw, kb, fan_in, fan_out):
        bound = 1.0 / math.sqrt(fan_in)
        w = jax.random.uniform(kw, (fan_in, fan_out), jnp.float32, -bound, bound)
        b = jax.random.uniform(kb, (fan_out,), jnp.float32, -bound, bound)
        return w, b

    wq, bq = linear(ks[0], ks[1], DIM_Q, DIM_V)
    wk, bk = linear(ks[2], ks[3], DIM_K, DIM_V)
    wv, bv = linear(ks[4], ks[5], DIM_K, DIM_V)
    wo, bo = linear(ks[6], ks[7], DIM_V, DIM_V)
    return (wq, bq, wk, bk, wv, bv, wo, bo)


if __name__ == "__main__":
    key = jax.random.PRNGKey(0)
    k_q, k_v, k_p = jax.random.split(key, 3)

    Q = jax.random.normal(k_q, (B, NQ, DIM_Q), jnp.float32)
    Vin = jax.random.normal(k_v, (B, NK, DIM_K), jnp.float32)
    params = _init_params(k_p)
    slab = pack_params(params)            # one-time weight/bias/constant packing

    out = mab_forward(Q, Vin, slab)
    out = jax.block_until_ready(out)

    ref = mab_reference(Q, Vin, params)
    np.testing.assert_allclose(np.asarray(out), np.asarray(ref), rtol=1e-5, atol=1e-5)

    print("KERNEL_OK")
</pallas_src>

<mosaic_0001>
module attributes {stable_mosaic.version = 11 : i64} {
  func.func @mab_kernel(%arg0: memref<16x16xf32, #tpu.memory_space<vmem>>, %arg1: memref<24x24xf32, #tpu.memory_space<vmem>>, %arg2: memref<256x144xf32, #tpu.memory_space<vmem>>, %arg3: memref<16x48xf32, #tpu.memory_space<vmem>>) attributes {dimension_semantics = [], scalar_prefetch = 0 : i64, scratch_operands = 0 : i64, tpu.core_type = #tpu.core_type<tc>} {
    %c0 = arith.constant 0 : index
    %c0_0 = arith.constant 0 : index
    %0 = vector.load %arg0[%c0, %c0_0] : memref<16x16xf32, #tpu.memory_space<vmem>>, vector<16x16xf32>
    %c0_1 = arith.constant 0 : index
    %c0_2 = arith.constant 0 : index
    %1 = vector.load %arg1[%c0_1, %c0_2] : memref<24x24xf32, #tpu.memory_space<vmem>>, vector<24x24xf32>
    %c16 = arith.constant 16 : index
    %c0_3 = arith.constant 0 : index
    %2 = vector.load %arg2[%c16, %c0_3] : memref<256x144xf32, #tpu.memory_space<vmem>>, vector<16x48xf32>
    %c32 = arith.constant 32 : index
    %c0_4 = arith.constant 0 : index
    %3 = vector.load %arg2[%c32, %c0_4] : memref<256x144xf32, #tpu.memory_space<vmem>>, vector<24x96xf32>
    %c56 = arith.constant 56 : index
    %c0_5 = arith.constant 0 : index
    %4 = vector.load %arg2[%c56, %c0_5] : memref<256x144xf32, #tpu.memory_space<vmem>>, vector<48x48xf32>
    %c104 = arith.constant 104 : index
    %c0_6 = arith.constant 0 : index
    %5 = vector.load %arg2[%c104, %c0_6] : memref<256x144xf32, #tpu.memory_space<vmem>>, vector<8x48xf32>
    %c112 = arith.constant 112 : index
    %c0_7 = arith.constant 0 : index
    %6 = vector.load %arg2[%c112, %c0_7] : memref<256x144xf32, #tpu.memory_space<vmem>>, vector<144x48xf32>
    %c0_8 = arith.constant 0 : index
    %c0_9 = arith.constant 0 : index
    %7 = vector.load %arg2[%c0_8, %c0_9] : memref<256x144xf32, #tpu.memory_space<vmem>>, vector<16x144xf32>
    %cst = arith.constant dense<0.000000e+00> : vector<16x48xf32>
    %8 = tpu.matmul %0, %2, %cst {dimension_numbers = #tpu.dot_dimension_numbers<[1], [0], [0], [1], [0, 0, 1, 1], [], []>} : vector<16x16xf32>, vector<16x48xf32>, vector<16x48xf32> -> vector<16x48xf32>
    %9 = vector.extract_strided_slice %5 {offsets = [0, 0], sizes = [1, 48], strides = [1, 1]} : vector<8x48xf32> to vector<1x48xf32>
    %10 = vector.broadcast %9 : vector<1x48xf32> to vector<16x48xf32>
    %11 = arith.addf %8, %10 : vector<16x48xf32>
    %cst_10 = arith.constant dense<0.000000e+00> : vector<24x96xf32>
    %12 = tpu.matmul %1, %3, %cst_10 {dimension_numbers = #tpu.dot_dimension_numbers<[1], [0], [0], [1], [0, 0, 1, 1], [], []>} : vector<24x24xf32>, vector<24x96xf32>, vector<24x96xf32> -> vector<24x96xf32>
    %13 = vector.extract_strided_slice %12 {offsets = [0, 0], sizes = [24, 48], strides = [1, 1]} : vector<24x96xf32> to vector<24x48xf32>
    %14 = vector.extract_strided_slice %5 {offsets = [1, 0], sizes = [1, 48], strides = [1, 1]} : vector<8x48xf32> to vector<1x48xf32>
    %15 = vector.broadcast %14 : vector<1x48xf32> to vector<24x48xf32>
    %16 = arith.addf %13, %15 : vector<24x48xf32>
    %17 = vector.extract_strided_slice %12 {offsets = [0, 48], sizes = [24, 48], strides = [1, 1]} : vector<24x96xf32> to vector<24x48xf32>
    %18 = vector.extract_strided_slice %5 {offsets = [2, 0], sizes = [1, 48], strides = [1, 1]} : vector<8x48xf32> to vector<1x48xf32>
    %19 = vector.broadcast %18 : vector<1x48xf32> to vector<24x48xf32>
    %20 = arith.addf %17, %19 : vector<24x48xf32>
    %21 = tpu.concatenate %16, %16, %16, %16, %16, %16 in 0 : vector<24x48xf32>, vector<24x48xf32>, vector<24x48xf32>, vector<24x48xf32>, vector<24x48xf32>, vector<24x48xf32> -> vector<144x48xf32>
    %22 = arith.mulf %21, %6 : vector<144x48xf32>
    %23 = tpu.concatenate %20, %20, %20, %20, %20, %20 in 0 : vector<24x48xf32>, vector<24x48xf32>, vector<24x48xf32>, vector<24x48xf32>, vector<24x48xf32>, vector<24x48xf32> -> vector<144x48xf32>
    %24 = arith.mulf %23, %6 : vector<144x48xf32>
    %cst_11 = arith.constant dense<0.000000e+00> : vector<16x144xf32>
    %25 = tpu.matmul %11, %22, %cst_11 {dimension_numbers = #tpu.dot_dimension_numbers<[1], [1], [0], [0], [0, 0, 1, 0], [], []>} : vector<16x48xf32>, vector<144x48xf32>, vector<16x144xf32> -> vector<16x144xf32>
    %cst_12 = arith.constant 0.144337565 : f32
    %26 = vector.broadcast %cst_12 : f32 to vector<16x144xf32>
    %27 = arith.mulf %25, %26 : vector<16x144xf32>
    %28 = arith.addf %27, %7 : vector<16x144xf32>
    %cst_13 = arith.constant dense<0xFF800000> : vector<16xf32>
    %29 = vector.multi_reduction <maximumf>, %28, %cst_13 [1] : vector<16x144xf32> to vector<16xf32>
    %30 = vector.shape_cast %29 : vector<16xf32> to vector<16x1xf32>
    %31 = vector.broadcast %30 : vector<16x1xf32> to vector<16x144xf32>
    %32 = arith.subf %28, %31 : vector<16x144xf32>
    %33 = math.exp %32 : vector<16x144xf32>
    %cst_14 = arith.constant dense<0.000000e+00> : vector<16x48xf32>
    %34 = tpu.matmul %33, %24, %cst_14 {dimension_numbers = #tpu.dot_dimension_numbers<[1], [0], [0], [1], [0, 0, 1, 1], [], []>} : vector<16x144xf32>, vector<144x48xf32>, vector<16x48xf32> -> vector<16x48xf32>
    %cst_15 = arith.constant dense<0.000000e+00> : vector<16x48xf32>
    %35 = tpu.matmul %33, %6, %cst_15 {dimension_numbers = #tpu.dot_dimension_numbers<[1], [0], [0], [1], [0, 0, 1, 1], [], []>} : vector<16x144xf32>, vector<144x48xf32>, vector<16x48xf32> -> vector<16x48xf32>
    %36 = tpu.reciprocal %35 : vector<16x48xf32> -> vector<16x48xf32>
    %37 = arith.mulf %34, %36 : vector<16x48xf32>
    %38 = arith.addf %11, %37 : vector<16x48xf32>
    %cst_16 = arith.constant dense<0.000000e+00> : vector<16x48xf32>
    %39 = tpu.matmul %38, %4, %cst_16 {dimension_numbers = #tpu.dot_dimension_numbers<[1], [0], [0], [1], [0, 0, 1, 1], [], []>} : vector<16x48xf32>, vector<48x48xf32>, vector<16x48xf32> -> vector<16x48xf32>
    %40 = vector.extract_strided_slice %5 {offsets = [3, 0], sizes = [1, 48], strides = [1, 1]} : vector<8x48xf32> to vector<1x48xf32>
    %41 = vector.broadcast %40 : vector<1x48xf32> to vector<16x48xf32>
    %42 = arith.addf %39, %41 : vector<16x48xf32>
    %cst_17 = arith.constant 0.000000e+00 : f32
    %43 = vector.broadcast %cst_17 : f32 to vector<16x48xf32>
    %44 = arith.maximumf %42, %43 : vector<16x48xf32>
    %45 = arith.addf %38, %44 : vector<16x48xf32>
    %c0_18 = arith.constant 0 : index
    %c0_19 = arith.constant 0 : index
    %46 = vector.load %arg3[%c0_18, %c0_19] : memref<16x48xf32, #tpu.memory_space<vmem>>, vector<16x48xf32>
    tpu.vector_store %arg3[%c0_18, %c0_19], %45 {strides = array<i32>} : memref<16x48xf32, #tpu.memory_space<vmem>>, vector<16x48xf32>,
    return
  }
}

</mosaic_0001>

<bundles_post_ra>
// kernel: mab_forward.1
= control target key start
LH: loop header
LB: loop body
LE: loop exit
PB: predicated region body
PF: predicated region fallthrough
CT: control target
= control target key end

     0   :  { %s753_s18 = smov 48   ;;  %vm85_vm0 = vcmask 195584   ;;  %s1127_s0 = inlined_call_operand.vmem [shape: f32[16,16], index: 0, kind: input, shape index: {}]   ;;  %s1128_s1 = inlined_call_operand.vmem [shape: f32[24,24], index: 1, kind: input, shape index: {}]   ;;  %s1129_s2 = inlined_call_operand.vmem [shape: f32[256,144], index: 2, kind: input, shape index: {}]   ;;  %s1130_s3 = inlined_call_operand.hbm [shape: f32[16,48], index: 3, kind: output, shape index: {}]  }
   0x1   :  { %v781_v0 = vld [vmem:[%s1129_s2 + $0x1e0] sm:$0xff]  ;;  %v789_v2 = vld [vmem:[%s1129_s2 + $0xd0] sm:$0xff] }
   0x2   :  { %v24_v1 = vld [vmem:[%s1129_s2 + $0x60] sm:$0xff]  ;;  %201 = vrot.lane.b32.xlu1 %v781_v0, %s753_s18  ;;  %v125_v3 = vperm.slane %v789_v2, 2  ;;  %v23_v4 = vld [vmem:[%s1129_s2 + $0x50] sm:$0xff] }
   0x3   :  { %108 = vmatpush.msra.mxu1 %v24_v1  ;;  %v22_v5 = vld [vmem:[%s1129_s2 + $0x40] sm:$0xff]  ;;  %v815_v8 = vld [vmem:[%s1129_s2 + $0x1d0] sm:$0xff] }
   0x4   :  { %127 = vrot.lane.b32.xlu0 %v125_v3, %s753_s18  ;;  %v17_v6 = vld [vmem:[%s1128_s1] sm:$0xff] }
   0x5   :  { %109 = vmatpush.msra.mxu1 %v23_v4  ;;  %v807_v7 = vld [vmem:[%s1129_s2 + $0x1c0] sm:$0xff] }
   0x6   :  { %197 = vrot.lane.b32.xlu2 %v807_v7, %s753_s18 }
   0x7   :  { %110 = vmatpush.msra.mxu1 %v22_v5 }
   0x8   :  { %634 = vmatmul.msk.f32.vlgmr.msra.gmra.mxu1 %vm85_vm0, %v17_v6 }
   0x9   :  { %8 = vsyncpa [#allocation3], 0  ;;  %500 = vmatpush.msrb.mxu1 %v815_v8  ;;  %v821_v9 = vld [vmem:[%s1129_s2 + $0x1f0] sm:$0xff]  ;;  %v18_v11 = vld [vmem:[%s1128_s1 + $0x8] sm:$0xff]  ;;  %vm55_vm1 = vcmask 130048   ;;  %v121_v34 = vperm.slane %v789_v2, 1 }
   0xa   :  { %199 = vrot.lane.b32.xlu1 %v815_v8, %s753_s18  ;;  %v829_v10 = vld [vmem:[%s1129_s2 + $0x1b0] sm:$0xff]  ;;  %v840_v12 = vld [vmem:[%s1129_s2 + $0x1a0] sm:$0xff]  ;;  %v16_v27 = vld [vmem:[%s1127_s0 + $0x8] sm:$0xff]  ;;  %vm241_vm2 = vcmask 392192   ;;  %s620_s12 = sshll.u32 %s1130_s3, 4  ;;  %s756_s13 = smov 128   ;;  %s621_s12 = int_to_ptr.hbm [resolvable:$true] %s620_s12 }
   0xb   :  { %501 = vmatpush.msrb.mxu1 %v807_v7  ;;  %v849_v13 = vld [vmem:[%s1129_s2 + $0x190] sm:$0xff]  ;;  %v855_v14 = vld [vmem:[%s1129_s2 + $0x180] sm:$0xff]  ;;  %s757_s14 = smov 8  }
   0xc   :  { %203 = vrot.lane.b32.xlu0 %v821_v9, %s753_s18  ;;  %v863_v15 = vld [vmem:[%s1129_s2 + $0x170] sm:$0xff]  ;;  %v874_v17 = vld [vmem:[%s1129_s2 + $0x160] sm:$0xff] }
   0xd   :  { %502 = vmatpush.msrb.mxu1 %v829_v10  ;;  %v19_v16 = vld [vmem:[%s1128_s1 + $0x10] sm:$0xff]  ;;  %v889_v19 = vld [vmem:[%s1129_s2 + $0x140] sm:$0xff] }
   0xe   :  { %195 = vrot.lane.b32.xlu2 %v829_v10, %s753_s18  ;;  %v883_v18 = vld [vmem:[%s1129_s2 + $0x150] sm:$0xff]  ;;  %v20_v21 = vld [vmem:[%s1129_s2 + $0x20] sm:$0xff] }
   0xf   :  { %503 = vmatpush.msrb.mxu1 %v840_v12  ;;  %v21_v20 = vld [vmem:[%s1129_s2 + $0x30] sm:$0xff]  ;;  %v15_v23 = vld [vmem:[%s1127_s0] sm:$0xff]  ;;  %s754_s0 = smov 80  }
  0x10   :  { %635 = vmatmul.msk.f32.gmra.mxu1 %vm85_vm0, %v18_v11  ;;  %v903_v22 = vld [vmem:[%s1129_s2 + $0x130] sm:$0xff]  ;;  %76 = vmatpush.msra.mxu0 %v21_v20  ;;  %v914_v24 = vld [vmem:[%s1129_s2 + $0x120] sm:$0xff] }
  0x11   :  { %504 = vmatpush.msrb.mxu1 %v849_v13  ;;  %v923_v25 = vld [vmem:[%s1129_s2 + $0x110] sm:$0xff]  ;;  %v931_v26 = vld [vmem:[%s1129_s2 + $0x100] sm:$0xff] }
  0x12   :  { %191 = vrot.lane.b32.xlu1 %v849_v13, %s753_s18  ;;  %77 = vmatpush.msra.mxu0 %v20_v21  ;;  %v942_v28 = vld [vmem:[%s1129_s2 + $0xf0] sm:$0xff]  ;;  %v948_v29 = vld [vmem:[%s1129_s2 + $0xe0] sm:$0xff] }
  0x13   :  { %505 = vmatpush.msrb.mxu1 %v855_v14  ;;  %632 = vmatmul.msk.f32.vlgmr.msra.gmra.mxu0 %vm55_vm1, %v15_v23 }
  0x14   :  { %193 = vrot.lane.b32.xlu0 %v840_v12, %s753_s18 }
  0x15   :  { %506 = vmatpush.msrb.mxu1 %v863_v15 }
  0x16   :  { %189 = vrot.lane.b32.xlu2 %v855_v14, %s753_s18 }
  0x17   :  { %507 = vmatpush.msrb.mxu1 %v874_v17 }
  0x18   :  { %636 = vmatmul.msk.f32.gmra.mxu1 %vm85_vm0, %v19_v16 }
  0x19   :  { %508 = vmatpush.msrb.mxu1 %v883_v18 }
  0x1a   :  { %185 = vrot.lane.b32.xlu1 %v874_v17, %s753_s18 }
  0x1b   :  { %509 = vmatpush.msrb.mxu1 %v889_v19  ;;  %633 = vmatmul.msk.f32.gmra.mxu0 %vm55_vm1, %v16_v27 }
  0x1c   :  { %187 = vrot.lane.b32.xlu0 %v863_v15, %s753_s18 }
  0x1d   :  { %510 = vmatpush.msrb.mxu1 %v903_v22 }
  0x1e   :  { %183 = vrot.lane.b32.xlu2 %v883_v18, %s753_s18 }
  0x1f   :  { %511 = vmatpush.msrb.mxu1 %v914_v24 }
  0x21   :  { %512 = vmatpush.msrb.mxu1 %v923_v25 }
  0x22   :  { %179 = vrot.lane.b32.xlu1 %v903_v22, %s753_s18 }
  0x23   :  { %513 = vmatpush.msrb.mxu1 %v931_v26 }
  0x24   :  { %181 = vrot.lane.b32.xlu0 %v889_v19, %s753_s18 }
  0x25   :  { %514 = vmatpush.msrb.mxu1 %v942_v28 }
  0x27   :  { %515 = vmatpush.msrb.mxu1 %v948_v29 }
  0x2a   :  { %175 = vrot.lane.b32.xlu1 %v923_v25, %s753_s18 }
  0x2c   :  { %177 = vrot.lane.b32.xlu0 %v914_v24, %s753_s18 }
  0x32   :  { %171 = vrot.lane.b32.xlu1 %v942_v28, %s753_s18 }
  0x34   :  { %173 = vrot.lane.b32.xlu0 %v931_v26, %s753_s18 }
  0x3a   :  { %169 = vrot.lane.b32.xlu1 %v948_v29, %s753_s18 }
  0x60   :  { %v198_v35 = vpop.permute.xlu2 %197 }
  0x68   :  { %v196_v45 = vpop.permute.xlu2 %195 }
  0x70   :  { %v190_v21 = vpop.permute.xlu2 %189 }
  0x74   :  { %v202_v30 = vpop.permute.xlu1 %201 }
  0x76   :  { %v128_v31 = vpop.permute.xlu0 %127 }
  0x7c   :  { %v200_v32 = vpop.permute.xlu1 %199 }
  0x7e   :  { %v204_v33 = vpop.permute.xlu0 %203 }
  0x84   :  { %v192_v36 = vpop.permute.xlu1 %191 }
  0x85   :  { %v112_v37 = vpop.f32.mrf.mxu1 }
  0x86   :  { %v963_v38 = vadd.f32 %v121_v34, %v112_v37  ;;  %v194_v39 = vpop.permute.xlu0 %193  ;;  %v968_v41 = vadd.f32 %v128_v31, %v112_v37 }
  0x88   :  { %v148_v40 = vmul.f32 %v963_v38, %v815_v8  ;;  %v235_v47 = vmul.f32 %v194_v39, %v968_v41  ;;  %v238_v8 = vmul.f32 %v200_v32, %v968_v41 }
  0x8a   :  { %637 = vmatpush.xpose.msk.msra.mxu2 %vm241_vm2, %v148_v40 }
  0x8c   :  { %v186_v42 = vpop.permute.xlu1 %185 }
  0x8d   :  { %v115_v43 = vpop.f32.mrf.mxu1 }
  0x8e   :  { %v970_v44 = vadd.f32 %v128_v31, %v115_v43  ;;  %v188_v46 = vpop.permute.xlu0 %187  ;;  %v977_v54 = vadd.f32 %v121_v34, %v115_v43 }
  0x90   :  { %v236_v48 = vmul.f32 %v196_v45, %v970_v44  ;;  %v239_v58 = vmul.f32 %v202_v30, %v970_v44  ;;  %v146_v62 = vmul.f32 %v977_v54, %v829_v10  ;;  %v149_v63 = vmul.f32 %v977_v54, %v781_v0 }
  0x91   :  { %v233_v30 = vmul.f32 %v190_v21, %v970_v44 }
  0x92   :  { %v670_v49 = vpack.i.bf16 %v235_v47, %v236_v48  ;;  %v139_v47 = vmul.f32 %v963_v38, %v889_v19  ;;  %v137_v19 = vmul.f32 %v977_v54, %v914_v24  ;;  %v133_v24 = vmul.f32 %v963_v38, %v948_v29 }
  0x94   :  { %671 = vrot.lane.b32.xlu2 %v670_v49, %s754_s0  ;;  %v180_v50 = vpop.permute.xlu1 %179 }
  0x95   :  { %v118_v51 = vpop.f32.mrf.mxu1 }
  0x96   :  { %v975_v52 = vadd.f32 %v121_v34, %v118_v51  ;;  %v132_v53 = vadd.f32 %v128_v31, %v118_v51  ;;  %v182_v55 = vpop.permute.xlu0 %181  ;;  %v54_v34 = vperm.slane %v789_v2, 0 }
  0x97   :  { %v229_v43 = vmul.f32 %v182_v55, %v968_v41  ;;  %v136_v55 = vmul.f32 %v963_v38, %v923_v25 }
  0x98   :  { %v147_v56 = vmul.f32 %v975_v52, %v807_v7  ;;  %v150_v57 = vmul.f32 %v975_v52, %v821_v9  ;;  %v240_v59 = vmul.f32 %v204_v33, %v132_v53  ;;  %v984_v60 = vmul.f32 %v180_v50, %v132_v53 }
  0x99   :  { %v237_v4 = vmul.f32 %v198_v35, %v132_v53  ;;  %v145_v7 = vmul.f32 %v963_v38, %v840_v12  ;;  %v144_v16 = vmul.f32 %v975_v52, %v849_v13  ;;  %v234_v20 = vmul.f32 %v192_v36, %v132_v53  ;;  %v79_v35 = vpop.f32.mrf.mxu0 }
  0x9a   :  { %638 = vmatpush.xpose.msk.msra.mxu2 %vm241_vm2, %v147_v56  ;;  %655 = vmatpush.xpose.msk.msra.mxu3 %vm241_vm2, %v150_v57  ;;  %v675_v61 = vpack.i.bf16 %v239_v58, %v240_v59  ;;  %v143_v12 = vmul.f32 %v977_v54, %v855_v14  ;;  %v142_v13 = vmul.f32 %v963_v38, %v863_v15 }
  0x9b   :  { %v680_v11 = vpack.i.bf16 %v237_v4, %v238_v8  ;;  %v685_v32 = vpack.i.bf16 %v233_v30, %v234_v20  ;;  %v231_v33 = vmul.f32 %v186_v42, %v132_v53  ;;  %v232_v14 = vmul.f32 %v188_v46, %v968_v41  ;;  %v184_v42 = vpop.permute.xlu2 %183 }
  0x9c   :  { %676 = vrot.lane.b32.xlu1 %v675_v61, %s754_s0  ;;  %v176_v1 = vpop.permute.xlu1 %175  ;;  %v141_v36 = vmul.f32 %v975_v52, %v874_v17  ;;  %v1027_v37 = vadd.f32 %v79_v35, %v54_v34  ;;  %v140_v15 = vmul.f32 %v977_v54, %v883_v18  ;;  %v230_v46 = vmul.f32 %v184_v42, %v970_v44 }
  0x9d   :  { %v994_v3 = vmul.f32 %v176_v1, %v968_v41  ;;  %v690_v40 = vpack.i.bf16 %v231_v33, %v232_v14  ;;  %v138_v49 = vmul.f32 %v975_v52, %v903_v22  ;;  %v135_v22 = vmul.f32 %v975_v52, %v931_v26 }
  0x9e   :  { %639 = vmatpush.xpose.msk.msra.mxu2 %vm241_vm2, %v146_v62  ;;  %656 = vmatpush.xpose.msk.msra.mxu3 %vm241_vm2, %v149_v63  ;;  %v178_v5 = vpop.permute.xlu0 %177  ;;  %v695_v48 = vpack.i.bf16 %v229_v43, %v230_v46 }
  0x9f   :  { %v999_v6 = vmul.f32 %v178_v5, %v970_v44 }
  0xa1   :  { %v700_v10 = vpack.i.bf16 %v999_v6, %v984_v60  ;;  %657 = vmatmul.msk.f32.vlgmr.msra.gmra.mxu3 %vm241_vm2, %v1027_v37  ;;  %v82_v17 = vpop.f32.mrf.mxu0 }
  0xa2   :  { %640 = vmatpush.xpose.msk.msra.mxu2 %vm241_vm2, %v145_v7  ;;  %v1037_v45 = vadd.f32 %v82_v17, %v54_v34  ;;  %v51_v7 = vld [vmem:[%s1129_s2 + $0x8] sm:$0xff]  ;;  %v52_v34 = vld [vmem:[%s1129_s2 + $0x10] sm:$0xff] }
  0xa4   :  { %681 = vrot.lane.b32.xlu1 %v680_v11, %s754_s0  ;;  %v172_v39 = vpop.permute.xlu1 %171 }
  0xa5   :  { %v224_v51 = vmul.f32 %v172_v39, %v970_v44 }
  0xa6   :  { %641 = vmatpush.xpose.msk.msra.mxu2 %vm241_vm2, %v144_v16  ;;  %v174_v23 = vpop.permute.xlu0 %173  ;;  %v50_v16 = vld [vmem:[%s1129_s2] sm:$0xff] }
  0xa7   :  { %v1011_v27 = vmul.f32 %v174_v23, %v132_v53 }
  0xa9   :  { %v705_v31 = vpack.i.bf16 %v1011_v27, %v994_v3  ;;  %658 = vmatmul.msk.f32.gmra.mxu3 %vm241_vm2, %v1037_v45 }
  0xaa   :  { %642 = vmatpush.xpose.msk.msra.mxu2 %vm241_vm2, %v143_v12 }
  0xac   :  { %686 = vrot.lane.b32.xlu1 %v685_v32, %s754_s0  ;;  %v170_v18 = vpop.permute.xlu1 %169  ;;  %v53_v32 = vld [vmem:[%s1129_s2 + $0x18] sm:$0xff] }
  0xad   :  { %v223_v50 = vmul.f32 %v170_v18, %v968_v41  ;;  %v134_v41 = vmul.f32 %v977_v54, %v942_v28 }
  0xae   :  { %643 = vmatpush.xpose.msk.msra.mxu2 %vm241_vm2, %v142_v13 }
  0xaf   :  { %v710_v53 = vpack.i.bf16 %v223_v50, %v224_v51 }
  0xb2   :  { %644 = vmatpush.xpose.msk.msra.mxu2 %vm241_vm2, %v141_v36 }
  0xb4   :  { %691 = vrot.lane.b32.xlu1 %v690_v40, %s754_s0 }
  0xb6   :  { %645 = vmatpush.xpose.msk.msra.mxu2 %vm241_vm2, %v140_v15 }
  0xba   :  { %646 = vmatpush.xpose.msk.msra.mxu2 %vm241_vm2, %v139_v47 }
  0xbc   :  { %696 = vrot.lane.b32.xlu1 %v695_v48, %s754_s0 }
  0xbe   :  { %647 = vmatpush.xpose.msk.msra.mxu2 %vm241_vm2, %v138_v49 }
  0xc2   :  { %648 = vmatpush.xpose.msk.msra.mxu2 %vm241_vm2, %v137_v19 }
  0xc4   :  { %711 = vrot.lane.b32.xlu1 %v710_v53, %s754_s0 }
  0xc6   :  { %649 = vmatpush.xpose.msk.msra.mxu2 %vm241_vm2, %v136_v55 }
  0xca   :  { %650 = vmatpush.xpose.msk.msra.mxu2 %vm241_vm2, %v135_v22 }
  0xce   :  { %651 = vmatpush.xpose.msk.msra.mxu2 %vm241_vm2, %v134_v41 }
  0xd2   :  { %652 = vmatpush.xpose.msk.msra.mxu2 %vm241_vm2, %v133_v24 }
  0xd5   :  { %653 = vmatmul.msk.f32.vlgmr.msra.gmra.mxu2 %vm241_vm2, %v1027_v37 }
  0xdd   :  { %654 = vmatmul.msk.f32.gmra.mxu2 %vm241_vm2, %v1037_v45 }
  0xee   :  { %v672_v29 = vpop.permute.xlu2 %671 }
  0xef   :  { %v673_v54 = vunpack.i.l.bf16 %v672_v29  ;;  %v674_v56 = vunpack.i.h.bf16 %v672_v29  ;;  %v26_v29 = vld [vmem:[%s1129_s2 + $0x80] sm:$0xff] }
 0x10e   :  { %v677_v25 = vpop.permute.xlu1 %676 }
 0x10f   :  { %v678_v26 = vunpack.i.l.bf16 %v677_v25  ;;  %v679_v44 = vunpack.i.h.bf16 %v677_v25  ;;  %v30_v25 = vld [vmem:[%s1129_s2 + $0xc0] sm:$0xff] }
 0x111   :  { %491 = vmatpush.msrb.mxu3 %v678_v26 }
 0x113   :  { %492 = vmatpush.msrb.mxu3 %v679_v44  ;;  %v29_v44 = vld [vmem:[%s1129_s2 + $0xb0] sm:$0xff] }
 0x115   :  { %537 = vmatpush.msra.mxu3 %v821_v9 }
 0x116   :  { %v682_v28 = vpop.permute.xlu1 %681 }
 0x117   :  { %538 = vmatpush.msra.mxu3 %v781_v0  ;;  %v683_v52 = vunpack.i.l.bf16 %v682_v28  ;;  %v684_v38 = vunpack.i.h.bf16 %v682_v28  ;;  %v28_v28 = vld [vmem:[%s1129_s2 + $0xa0] sm:$0xff] }
 0x119   :  { %454 = vmatpush.msrb.mxu0 %v683_v52  ;;  %v27_v52 = vld [vmem:[%s1129_s2 + $0x90] sm:$0xff] }
 0x11b   :  { %455 = vmatpush.msrb.mxu0 %v684_v38 }
 0x11d   :  { %456 = vmatpush.msrb.mxu0 %v673_v54  ;;  %v25_v54 = vld [vmem:[%s1129_s2 + $0x70] sm:$0xff]  ;;  %s755_s2 = smov [#allocation2]  }
 0x11e   :  { %v687_v57 = vpop.permute.xlu1 %686  ;;  %s618_s9 = sshll.u32 %s755_s2, 4  ;;  %s619_s9 = int_to_ptr.vmem [resolvable:$true] %s618_s9 }
 0x11f   :  { %457 = vmatpush.msrb.mxu0 %v674_v56  ;;  %v688_v58 = vunpack.i.l.bf16 %v687_v57  ;;  %v689_v59 = vunpack.i.h.bf16 %v687_v57 }
 0x121   :  { %458 = vmatpush.msrb.mxu0 %v688_v58 }
 0x123   :  { %459 = vmatpush.msrb.mxu0 %v689_v59 }
 0x124   :  { %v342_v4 = vpop.f32.mrf.mxu3 }
 0x125   :  { %v349_v5 = vmul.f32 0.14433756, %v342_v4 }
 0x126   :  { %v692_v61 = vpop.permute.xlu1 %691 }
 0x127   :  { %v693_v62 = vunpack.i.l.bf16 %v692_v61  ;;  %v694_v9 = vunpack.i.h.bf16 %v692_v61  ;;  %v353_v8 = vadd.f32 %v349_v5, %v51_v7 }
 0x129   :  { %460 = vmatpush.msrb.mxu0 %v693_v62  ;;  %v356_v12 = vsel %vm55_vm1, %v353_v8, -inf }
 0x12b   :  { %461 = vmatpush.msrb.mxu0 %v694_v9 }
 0x12c   :  { %v345_v11 = vpop.f32.mrf.mxu3 }
 0x12d   :  { %v351_v23 = vmul.f32 0.14433756, %v345_v11 }
 0x12e   :  { %v697_v0 = vpop.permute.xlu1 %696 }
 0x12f   :  { %v698_v63 = vunpack.i.l.bf16 %v697_v0  ;;  %v699_v1 = vunpack.i.h.bf16 %v697_v0  ;;  %v355_v33 = vadd.f32 %v351_v23, %v53_v32 }
 0x131   :  { %462 = vmatpush.msrb.mxu0 %v698_v63  ;;  %v360_v36 = vsel %vm55_vm1, %v355_v33, -inf }
 0x133   :  { %463 = vmatpush.msrb.mxu0 %v699_v1 }
 0x136   :  { %v712_v55 = vpop.permute.xlu1 %711 }
 0x137   :  { %v713_v41 = vunpack.i.l.bf16 %v712_v55  ;;  %v714_v24 = vunpack.i.h.bf16 %v712_v55 }
 0x158   :  { %v319_v20 = vpop.f32.mrf.mxu2 }
 0x159   :  { %v348_v21 = vmul.f32 0.14433756, %v319_v20 }
 0x15b   :  { %v352_v30 = vadd.f32 %v348_v21, %v50_v16 }
 0x15d   :  { %v357_v13 = vmax.f32 %v352_v30, %v356_v12 }
 0x15f   :  { %358 = vmax.xlane.f32.xlu2 %v357_v13 }
 0x160   :  { %v322_v35 = vpop.f32.mrf.mxu2 }
 0x161   :  { %v350_v14 = vmul.f32 0.14433756, %v322_v35 }
 0x163   :  { %v354_v39 = vadd.f32 %v350_v14, %v52_v34 }
 0x165   :  { %v361_v40 = vmax.f32 %v354_v39, %v360_v36 }
 0x167   :  { %362 = vmax.xlane.f32.xlu0 %v361_v40 }
 0x177   :  { %701 = vrot.lane.b32.xlu2 %v700_v10, %s754_s0 }
 0x17b   :  { %706 = vrot.lane.b32.xlu0 %v705_v31, %s754_s0 }
 0x1d2   :  { %v359_v15 = vpop.xlane.xlu2 %358 }
 0x1d3   :  { %v364_v42 = vsub.f32 %v352_v30, %v359_v15  ;;  %v365_v43 = vsub.f32 %v353_v8, %v359_v15 }
 0x1d5   :  { %v368_v17 = vmul.f32 1.442695, %v364_v42  ;;  %v370_v46 = vmul.f32 1.442695, %v365_v43 }
 0x1d7   :  { %715 = vpow2.f32 %v368_v17 }
 0x1d8   :  { %717 = vpow2.f32 %v370_v46 }
 0x1da   :  { %v702_v47 = vpop.permute.xlu2 %701  ;;  %v363_v48 = vpop.xlane.xlu0 %362 }
 0x1db   :  { %v703_v18 = vunpack.i.l.bf16 %v702_v47  ;;  %v366_v49 = vsub.f32 %v354_v39, %v363_v48  ;;  %v367_v50 = vsub.f32 %v355_v33, %v363_v48  ;;  %v704_v60 = vunpack.i.h.bf16 %v702_v47 }
 0x1dd   :  { %v716_v51 = vpop.eup %715  ;;  %v372_v6 = vmul.f32 1.442695, %v366_v49  ;;  %v374_v10 = vmul.f32 1.442695, %v367_v50  ;;  %464 = vmatpush.msrb.mxu0 %v703_v18 }
 0x1de   :  { %v718_v19 = vpop.eup %717  ;;  %516 = vmatmul.f32.vlgmr.msrb.gmra.mxu1 %v716_v51 }
 0x1df   :  { %719 = vpow2.f32 %v372_v6  ;;  %659 = vmatmul.msk.f32.vlgmr.msrb.gmra.mxu3 %vm55_vm1, %v718_v19  ;;  %465 = vmatpush.msrb.mxu0 %v704_v60 }
 0x1e0   :  { %721 = vpow2.f32 %v374_v10 }
 0x1e5   :  { %v720_v3 = vpop.eup %719 }
 0x1e6   :  { %v722_v27 = vpop.eup %721  ;;  %519 = vmatmul.f32.gmra.mxu1 %v720_v3 }
 0x1e7   :  { %660 = vmatmul.msk.f32.gmra.mxu3 %vm55_vm1, %v722_v27 }
 0x1ed   :  { %v707_v31 = vpop.permute.xlu0 %706 }
 0x1ee   :  { %v708_v53 = vunpack.i.l.bf16 %v707_v31  ;;  %v709_v22 = vunpack.i.h.bf16 %v707_v31 }
 0x1ef   :  { %661 = vmatmul.msk.f32.vlgmr.msra.gmra.mxu3 %vm55_vm1, %v718_v19 }
 0x1f0   :  { %466 = vmatpush.msrb.mxu0 %v708_v53 }
 0x1f2   :  { %467 = vmatpush.msrb.mxu0 %v709_v22 }
 0x1f4   :  { %468 = vmatpush.msrb.mxu0 %v713_v41 }
 0x1f6   :  { %469 = vmatpush.msrb.mxu0 %v714_v24 }
 0x1f7   :  { %662 = vmatmul.msk.f32.gmra.mxu3 %vm55_vm1, %v722_v27  ;;  %470 = vmatmul.f32.vlgmr.msrb.gmra.mxu0 %v716_v51 }
 0x1f8   :  { %595 = vmatpush.msra.mxu0 %v30_v25 }
 0x1fa   :  { %596 = vmatpush.msra.mxu0 %v29_v44 }
 0x1fc   :  { %597 = vmatpush.msra.mxu0 %v28_v28 }
 0x1fe   :  { %598 = vmatpush.msra.mxu0 %v27_v52 }
 0x1ff   :  { %473 = vmatmul.f32.gmra.mxu0 %v720_v3 }
 0x200   :  { %599 = vmatpush.msra.mxu0 %v26_v29 }
 0x202   :  { %600 = vmatpush.msra.mxu0 %v25_v54 }
 0x25b   :  { %v517_v56 = vpop.f32.mrf.mxu1 }
 0x262   :  { %v494_v26 = vpop.f32.mrf.mxu3 }
 0x263   :  { %v520_v59 = vpop.f32.mrf.mxu1 }
 0x26a   :  { %v497_v38 = vpop.f32.mrf.mxu3 }
 0x272   :  { %v540_v57 = vpop.f32.mrf.mxu3 }
 0x273   :  { %v541_v58 = vadd.f32 %v540_v57, %v517_v56 }
 0x274   :  { %v471_v1 = vpop.f32.mrf.mxu0 }
 0x275   :  { %723 = vrcp.f32 %v541_v58  ;;  %v557_v4 = vand.u32 2147483648, %v541_v58  ;;  %v555_v7 = vand.u32 2147483647, %v541_v58  ;;  %vm551_vm4 = vweird.f32 %v541_v58 }
 0x276   :  { %v495_v20 = vadd.f32 %v494_v26, %v471_v1 }
 0x277   :  { %v558_v16 = vor.u32 1.1754944e-38, %v557_v4  ;;  %vm556_vm6 = vcmp.eq.f32.partialorder %v555_v7, 8.507059e+37 }
 0x27a   :  { %v543_v61 = vpop.f32.mrf.mxu3 }
 0x27b   :  { %v724_v62 = vpop.eup %723  ;;  %v544_v9 = vadd.f32 %v543_v61, %v520_v59 }
 0x27c   :  { %v547_v0 = vmul.f32 %v724_v62, %v541_v58  ;;  %vm552_vm3 = vweird.f32 %v724_v62  ;;  %v474_v14 = vpop.f32.mrf.mxu0 }
 0x27d   :  { %725 = vrcp.f32 %v544_v9  ;;  %vm553_vm5 = vmor %vm551_vm4, %vm552_vm3  ;;  %v571_v13 = vand.u32 2147483648, %v544_v9  ;;  %v569_v35 = vand.u32 2147483647, %v544_v9  ;;  %vm565_vm8 = vweird.f32 %v544_v9 }
 0x27e   :  { %v548_v63 = vsub.f32 1.0, %v547_v0  ;;  %v498_v40 = vadd.f32 %v497_v38, %v474_v14 }
 0x27f   :  { %v572_v39 = vor.u32 1.1754944e-38, %v571_v13  ;;  %vm570_vm10 = vcmp.eq.f32.partialorder %v569_v35, 8.507059e+37 }
 0x280   :  { %v549_v5 = vmul.f32 %v724_v62, %v548_v63 }
 0x282   :  { %v550_v8 = vadd.f32 %v724_v62, %v549_v5 }
 0x283   :  { %v726_v11 = vpop.eup %725 }
 0x284   :  { %v554_v21 = vsel %vm553_vm5, %v724_v62, %v550_v8  ;;  %v561_v23 = vmul.f32 %v726_v11, %v544_v9  ;;  %vm566_vm7 = vweird.f32 %v726_v11 }
 0x285   :  { %v559_v12 = vsel %vm556_vm6, %v558_v16, %v554_v21  ;;  %vm567_vm9 = vmor %vm565_vm8, %vm566_vm7 }
 0x286   :  { %v574_v30 = vmul.f32 %v559_v12, %v495_v20  ;;  %v562_v32 = vsub.f32 1.0, %v561_v23 }
 0x288   :  { %v576_v33 = vadd.f32 %v574_v30, %v1027_v37  ;;  %v563_v34 = vmul.f32 %v726_v11, %v562_v32  ;;  %v578_v37 = vperm.slane %v789_v2, 3 }
 0x28a   :  { %v564_v36 = vadd.f32 %v726_v11, %v563_v34  ;;  %663 = vmatmul.msk.f32.vlgmr.msra.gmra.mxu0 %vm241_vm2, %v576_v33 }
 0x28c   :  { %v568_v15 = vsel %vm567_vm9, %v726_v11, %v564_v36 }
 0x28d   :  { %v573_v42 = vsel %vm570_vm10, %v572_v39, %v568_v15 }
 0x28e   :  { %v575_v43 = vmul.f32 %v573_v42, %v498_v40 }
 0x290   :  { %v577_v17 = vadd.f32 %v575_v43, %v1037_v45 }
 0x292   :  { %664 = vmatmul.msk.f32.gmra.mxu0 %vm241_vm2, %v577_v17 }
 0x307   :  { %v602_v46 = vpop.f32.mrf.mxu0 }
 0x308   :  { %v603_v47 = vadd.f32 %v602_v46, %v578_v37 }
 0x30a   :  { %v608_v48 = vmax.f32 %v603_v47, 0.0 }
 0x30c   :  { %v610_v18 = vadd.f32 %v608_v48, %v576_v33 }
 0x30e   :  { %612 = vst.msk [vmem:[#allocation2] sm:$0xff] %vm241_vm2, %v610_v18 }
 0x30f   :  { %v605_v49 = vpop.f32.mrf.mxu0 }
 0x310   :  { %v606_v50 = vadd.f32 %v605_v49, %v578_v37 }
 0x312   :  { %v609_v51 = vmax.f32 %v606_v50, 0.0 }
 0x314   :  { %v611_v45 = vadd.f32 %v609_v51, %v577_v17 }
 0x316   :  { %613 = vst.msk [vmem:[#allocation2 + $0x8] sm:$0xff] %vm241_vm2, %v611_v45 }
 0x317   :  { %626 = dma.vmem_to_hbm [thread:$0]  %s619_s9, 256, %s621_s12, [#allocation3], %s756_s13, %s756_s13, %s757_s14  }
 0x318   :  { %751 = dma.done.wait [#allocation3], 256  }
 0x319   :  { %752 = vsyncadd [#allocation3], 4294967040 }
 0x31a   :  { %631 = vsyncpa [#allocation3], 1 }

</bundles_post_ra>
